<compile_context>
chip_gen: v5e
topology: v5e:2x2
jax: 0.10.0
libtpu: 0.0.40
codegen_flags: <defaults>
</compile_context>

<pallas_src>
import jax
import jax.numpy as jnp
import numpy as np
from jax.experimental import pallas as pl
from jax.experimental.pallas import tpu as pltpu

_LANE = 128      # vreg lane width / MXU column granularity
_SUBLANE = 8     # vreg sublane granularity (f32)


def _round_up(x, m):
    return ((x + m - 1) // m) * m


def _pad2d(a, rows, cols):
    r, c = a.shape
    if r == rows and c == cols:
        return a
    return jnp.pad(a, ((0, rows - r), (0, cols - c)))


def _tpu_hints():
    """Best-effort generation detection; conservative (v7x-safe) fallbacks.

    Returns (vmem_capacity_bytes, bf16_act_ok, tensorcores_per_chip).
      * v5e/v6e: 128 MiB VMEM, 1 TensorCore; bf16 VPU/EUP only on v6e+.
      * v7x:     64 MiB VMEM per TC, 2 TensorCores, bf16 VPU/EUP.
    """
    vmem_cap = 64 << 20          # worst case (v7x per-TC VMEM)
    bf16_act = False             # v5e has no bf16 VPU/EUP -> keep f32 SiLU
    n_tc = 1
    kind = ""
    try:
        kind = jax.devices()[0].device_kind.lower()
    except Exception:
        pass
    if ("v5" in kind) or ("v6" in kind):
        vmem_cap = 128 << 20
    try:
        cap = getattr(pltpu.get_tpu_info(), "vmem_capacity_bytes", None)
        if cap:
            vmem_cap = int(cap)
    except Exception:
        pass
    if ("v6" in kind) or ("v7" in kind):
        bf16_act = True          # bf16 SiLU: halves inter-layer VPU/EUP work
    if "v7" in kind:
        n_tc = 2                 # megacore: want >= 2 grid steps per TC
    return vmem_cap, bf16_act, n_tc


def _make_kernel(n_layers, act_dtype, n_splits):
    """Fused MLP kernel for one batch tile; all weights resident in VMEM.

    The tile is split into `n_splits` independent row groups so the LLO
    scheduler can overlap one group's SiLU (VPU/EUP slots) with the other
    group's matmul (MXU slot) -- they live in different VLIW slots and carry
    no data dependency on each other.
    """
    def kernel(x_ref, *refs):
        out_ref = refs[-1]
        params = refs[:-1]
        rows = x_ref.shape[0] // n_splits
        hs = [x_ref[pl.ds(s * rows, rows), :] for s in range(n_splits)]
        for layer in range(n_layers):
            w = params[2 * layer][...]
            b = params[2 * layer + 1][...]
            if layer > 0:
                # SiLU; Dropout(p=0.15) is eval-mode identity.
                acts = []
                for h in hs:
                    a = h.astype(act_dtype)
                    acts.append(a * jax.nn.sigmoid(a))
                hs = acts
            hs = [jnp.dot(h.astype(w.dtype), w,
                          preferred_element_type=jnp.float32) + b
                  for h in hs]
        for s, h in enumerate(hs):
            out_ref[pl.ds(s * rows, rows), :] = jnp.tanh(h).astype(out_ref.dtype)
    return kernel


def linear_encoder_forward(x, weights, biases, *, batch_tile=512,
                           weight_dtype=jnp.bfloat16):
    """x: [B, in_size] f32. weights[i]: [in_i, out_i] f32. biases[i]: [1, out_i] f32.

    batch_tile: upper bound on rows per grid step (rounded to the sublane
      packing of `weight_dtype`); shrunk automatically to fit the per-chip
      VMEM budget and, on v7x, to give each TensorCore >= 2 grid steps.
    weight_dtype: explicit precision knob for the MXU operands. Default
      bf16 (f32 accumulation) for peak MXU throughput; pass jnp.float32 for a
      numerically exact match of the f32 PyTorch module.
    """
    B, in_size = x.shape
    n_layers = len(weights)
    assert len(biases) == n_layers

    vmem_cap, bf16_act, n_tc = _tpu_hints()
    w_itemsize = np.dtype(weight_dtype).itemsize
    act_dtype = jnp.bfloat16 if (bf16_act and w_itemsize < 4) else jnp.float32

    # Pad every feature dim to a multiple of 128 (lane-dense matmuls and
    # unmasked stores). Zero padding is exact: padded activations stay 0
    # through matmul/SiLU and are sliced off at the end.
    dims = [in_size] + [w.shape[1] for w in weights]
    dims_p = [_round_up(d, _LANE) for d in dims]
    out_size, out_p = dims[-1], dims_p[-1]

    # Row alignment follows the packing of the matmul operand dtype
    # (bf16 packs 16 rows per vreg tile).
    row_align = _SUBLANE * max(1, 4 // w_itemsize)
    out_itemsize = np.dtype(x.dtype).itemsize

    w_bytes = sum(dims_p[i] * dims_p[i + 1] * w_itemsize for i in range(n_layers))
    b_bytes = sum(dims_p[i + 1] * 4 for i in range(n_layers))

    def vmem_need(t):
        # Weights/biases are single-buffered (grid-invariant); x/out blocks are
        # double-buffered by the pipeline. 2x headroom is applied only to the
        # per-step (tiled + activation) bytes, not the resident weights.
        io = 2 * t * (dims_p[0] * w_itemsize + out_p * out_itemsize)
        act = 3 * t * max(dims_p) * 4            # f32 matmul accumulators
        return w_bytes + b_bytes + 2 * (io + act)

    # Batch tile: as large as requested, packing-aligned.
    B_al = _round_up(B, row_align)
    tile = min(_round_up(max(int(batch_tile), 1), row_align), B_al)

    # Megacore (v7x only): ensure >= 2 grid steps per TensorCore when B allows,
    # so each core's x/out double-buffering actually overlaps DMA with compute.
    # Single-TC chips (v5e/v6e) keep one big tile: splitting is pure overhead.
    min_steps = 2 * n_tc if n_tc > 1 else 1
    if min_steps > 1 and B_al >= min_steps * row_align:
        tile = min(tile, _round_up(pl.cdiv(B_al, min_steps), row_align))

    # Generation-aware VMEM budget (~78% of capacity, capped at 100 MiB):
    # ~50 MiB on v7x (64 MiB parts), ~100 MiB on v5e/v6e (128 MiB parts).
    budget = min(int(vmem_cap * 0.78), 100 << 20)
    while tile > row_align and vmem_need(tile) > budget:
        tile = _round_up(tile // 2, row_align)

    B_pad = _round_up(B, tile)
    grid = B_pad // tile

    # Split the tile into two independent row groups only if both halves stay
    # aligned to the dtype's sublane packing.
    n_splits = 2 if (tile % (2 * row_align) == 0) else 1

    # Pad inputs/params; x is cast where it is already being copied (the pad),
    # halving the only per-grid-step input DMA stream when weight_dtype is bf16.
    # Biases stay f32 (added to the f32 accumulator).
    x_p = _pad2d(x, B_pad, dims_p[0]).astype(weight_dtype)
    w_p = [_pad2d(w, dims_p[i], dims_p[i + 1]).astype(weight_dtype)
           for i, w in enumerate(weights)]
    b_p = [_pad2d(b, 1, dims_p[i + 1]).astype(jnp.float32)
           for i, b in enumerate(biases)]

    # Specs: x/out tiled over batch (default double-buffering); weights/biases
    # are grid-invariant -> single buffer halves their VMEM residency.
    in_specs = [pl.BlockSpec((tile, dims_p[0]), lambda i: (i, 0))]
    flat_params = []
    for w, b in zip(w_p, b_p):
        in_specs.append(pl.BlockSpec(w.shape, lambda i: (0, 0),
                                     pipeline_mode=pl.Buffered(1)))
        in_specs.append(pl.BlockSpec(b.shape, lambda i: (0, 0),
                                     pipeline_mode=pl.Buffered(1)))
        flat_params.extend([w, b])
    out_spec = pl.BlockSpec((tile, out_p), lambda i: (i, 0))

    vmem_limit = int(min(max(vmem_need(tile), 32 << 20), budget))

    flops = 2 * B_pad * sum(dims_p[i] * dims_p[i + 1] for i in range(n_layers))
    transcendentals = B_pad * sum(dims_p[1:])            # sigmoids + final tanh
    bytes_accessed = (B_pad * dims_p[0] * w_itemsize + w_bytes + b_bytes
                      + B_pad * out_p * out_itemsize)

    out = pl.pallas_call(
        _make_kernel(n_layers, act_dtype, n_splits),
        out_shape=jax.ShapeDtypeStruct((B_pad, out_p), x.dtype),
        grid_spec=pltpu.PrefetchScalarGridSpec(
            num_scalar_prefetch=0,
            grid=(grid,),
            in_specs=in_specs,
            out_specs=out_spec,
        ),
        compiler_params=pltpu.CompilerParams(
            dimension_semantics=("parallel",),
            vmem_limit_bytes=vmem_limit),
        cost_estimate=pl.CostEstimate(flops=flops,
                                      transcendentals=transcendentals,
                                      bytes_accessed=bytes_accessed),
    )(x_p, *flat_params)

    return out[:B, :out_size]


def init_params(key, in_size, channels):
    """Deterministic init mimicking nn.Linear default (uniform +-1/sqrt(fan_in))."""
    dims = [in_size] + list(channels)
    weights, biases = [], []
    for i in range(len(channels)):
        key, kw, kb = jax.random.split(key, 3)
        bound = 1.0 / np.sqrt(dims[i])
        w = jax.random.uniform(kw, (dims[i], dims[i + 1]),
                               minval=-bound, maxval=bound, dtype=jnp.float32)
        b = jax.random.uniform(kb, (1, dims[i + 1]),
                               minval=-bound, maxval=bound, dtype=jnp.float32)
        weights.append(w)
        biases.append(b)
    return weights, biases


def reference_forward(x, weights, biases):
    h = x @ weights[0] + biases[0]
    for w, b in zip(weights[1:], biases[1:]):
        h = h * jax.nn.sigmoid(h)
        h = h @ w + b
    return jnp.tanh(h)


if __name__ == "__main__":
    # Small shapes consistent with the module (scaled down from 512 / [512,1024,1024,256,8]).
    in_size = 32
    channels = [32, 64, 64, 32, 8]
    batch = 32

    key = jax.random.PRNGKey(0)
    key, kx = jax.random.split(key)
    x = jax.random.normal(kx, (batch, in_size), dtype=jnp.float32)
    weights, biases = init_params(key, in_size, channels)

    out = linear_encoder_forward(x, weights, biases)
    out = jax.block_until_ready(out)

    ref = reference_forward(x, weights, biases)
    assert out.shape == (batch, channels[-1])
    # Tolerance covers bf16 matmul operands (+ bf16 SiLU on v6e/v7x) with f32
    # accumulation; pass weight_dtype=jnp.float32 for an exact-precision run.
    np.testing.assert_allclose(np.asarray(out), np.asarray(ref),
                               rtol=4e-2, atol=4e-2)
    print("KERNEL_OK")
</pallas_src>

<mosaic_0001>
module attributes {stable_mosaic.version = 11 : i64} {
  func.func @kernel(%arg0: i32, %arg1: memref<32x128xbf16, #tpu.memory_space<vmem>>, %arg2: memref<128x128xbf16, #tpu.memory_space<vmem>>, %arg3: memref<1x128xf32, #tpu.memory_space<vmem>>, %arg4: memref<128x128xbf16, #tpu.memory_space<vmem>>, %arg5: memref<1x128xf32, #tpu.memory_space<vmem>>, %arg6: memref<128x128xbf16, #tpu.memory_space<vmem>>, %arg7: memref<1x128xf32, #tpu.memory_space<vmem>>, %arg8: memref<128x128xbf16, #tpu.memory_space<vmem>>, %arg9: memref<1x128xf32, #tpu.memory_space<vmem>>, %arg10: memref<128x128xbf16, #tpu.memory_space<vmem>>, %arg11: memref<1x128xf32, #tpu.memory_space<vmem>>, %arg12: memref<32x128xf32, #tpu.memory_space<vmem>>) attributes {dimension_semantics = [#tpu.dimension_semantics<parallel>], iteration_bounds = array<i64: 1>, scalar_prefetch = 0 : i64, scratch_operands = 0 : i64, tpu.core_type = #tpu.core_type<tc>, window_params = [{transform_indices = @transform_0, window_bounds = array<i64: 32, 128>}, {pipeline_mode = #tpu.pipeline_mode<synchronous>, transform_indices = @transform_1, window_bounds = array<i64: 128, 128>}, {pipeline_mode = #tpu.pipeline_mode<synchronous>, transform_indices = @transform_2, window_bounds = array<i64: 1, 128>}, {pipeline_mode = #tpu.pipeline_mode<synchronous>, transform_indices = @transform_3, window_bounds = array<i64: 128, 128>}, {pipeline_mode = #tpu.pipeline_mode<synchronous>, transform_indices = @transform_4, window_bounds = array<i64: 1, 128>}, {pipeline_mode = #tpu.pipeline_mode<synchronous>, transform_indices = @transform_5, window_bounds = array<i64: 128, 128>}, {pipeline_mode = #tpu.pipeline_mode<synchronous>, transform_indices = @transform_6, window_bounds = array<i64: 1, 128>}, {pipeline_mode = #tpu.pipeline_mode<synchronous>, transform_indices = @transform_7, window_bounds = array<i64: 128, 128>}, {pipeline_mode = #tpu.pipeline_mode<synchronous>, transform_indices = @transform_8, window_bounds = array<i64: 1, 128>}, {pipeline_mode = #tpu.pipeline_mode<synchronous>, transform_indices = @transform_9, window_bounds = array<i64: 128, 128>}, {pipeline_mode = #tpu.pipeline_mode<synchronous>, transform_indices = @transform_10, window_bounds = array<i64: 1, 128>}, {transform_indices = @transform_11, window_bounds = array<i64: 32, 128>}]} {
    %c0 = arith.constant 0 : index
    %c0_0 = arith.constant 0 : index
    %0 = vector.load %arg1[%c0, %c0_0] : memref<32x128xbf16, #tpu.memory_space<vmem>>, vector<16x128xbf16>
    %c16 = arith.constant 16 : index
    %c0_1 = arith.constant 0 : index
    %1 = vector.load %arg1[%c16, %c0_1] : memref<32x128xbf16, #tpu.memory_space<vmem>>, vector<16x128xbf16>
    %c0_2 = arith.constant 0 : index
    %c0_3 = arith.constant 0 : index
    %2 = vector.load %arg2[%c0_2, %c0_3] : memref<128x128xbf16, #tpu.memory_space<vmem>>, vector<128x128xbf16>
    %c0_4 = arith.constant 0 : index
    %c0_5 = arith.constant 0 : index
    %3 = vector.load %arg3[%c0_4, %c0_5] : memref<1x128xf32, #tpu.memory_space<vmem>>, vector<1x128xf32>
    %cst = arith.constant dense<0.000000e+00> : vector<16x128xf32>
    %4 = tpu.matmul %0, %2, %cst {dimension_numbers = #tpu.dot_dimension_numbers<[1], [0], [0], [1], [0, 0, 1, 1], [], []>} : vector<16x128xbf16>, vector<128x128xbf16>, vector<16x128xf32> -> vector<16x128xf32>
    %5 = vector.broadcast %3 : vector<1x128xf32> to vector<16x128xf32>
    %6 = arith.addf %4, %5 : vector<16x128xf32>
    %cst_6 = arith.constant dense<0.000000e+00> : vector<16x128xf32>
    %7 = tpu.matmul %1, %2, %cst_6 {dimension_numbers = #tpu.dot_dimension_numbers<[1], [0], [0], [1], [0, 0, 1, 1], [], []>} : vector<16x128xbf16>, vector<128x128xbf16>, vector<16x128xf32> -> vector<16x128xf32>
    %8 = vector.broadcast %3 : vector<1x128xf32> to vector<16x128xf32>
    %9 = arith.addf %7, %8 : vector<16x128xf32>
    %c0_7 = arith.constant 0 : index
    %c0_8 = arith.constant 0 : index
    %10 = vector.load %arg4[%c0_7, %c0_8] : memref<128x128xbf16, #tpu.memory_space<vmem>>, vector<128x128xbf16>
    %c0_9 = arith.constant 0 : index
    %c0_10 = arith.constant 0 : index
    %11 = vector.load %arg5[%c0_9, %c0_10] : memref<1x128xf32, #tpu.memory_space<vmem>>, vector<1x128xf32>
    %12 = arith.negf %6 : vector<16x128xf32>
    %13 = math.exp %12 : vector<16x128xf32>
    %cst_11 = arith.constant 1.000000e+00 : f32
    %14 = vector.broadcast %cst_11 : f32 to vector<16x128xf32>
    %15 = arith.addf %14, %13 : vector<16x128xf32>
    %16 = arith.divf %14, %15 : vector<16x128xf32>
    %17 = arith.mulf %6, %16 : vector<16x128xf32>
    %18 = arith.negf %9 : vector<16x128xf32>
    %19 = math.exp %18 : vector<16x128xf32>
    %cst_12 = arith.constant 1.000000e+00 : f32
    %20 = vector.broadcast %cst_12 : f32 to vector<16x128xf32>
    %21 = arith.addf %20, %19 : vector<16x128xf32>
    %22 = arith.divf %20, %21 : vector<16x128xf32>
    %23 = arith.mulf %9, %22 : vector<16x128xf32>
    %24 = arith.truncf %17 : vector<16x128xf32> to vector<16x128xbf16>
    %cst_13 = arith.constant dense<0.000000e+00> : vector<16x128xf32>
    %25 = tpu.matmul %24, %10, %cst_13 {dimension_numbers = #tpu.dot_dimension_numbers<[1], [0], [0], [1], [0, 0, 1, 1], [], []>} : vector<16x128xbf16>, vector<128x128xbf16>, vector<16x128xf32> -> vector<16x128xf32>
    %26 = vector.broadcast %11 : vector<1x128xf32> to vector<16x128xf32>
    %27 = arith.addf %25, %26 : vector<16x128xf32>
    %28 = arith.truncf %23 : vector<16x128xf32> to vector<16x128xbf16>
    %cst_14 = arith.constant dense<0.000000e+00> : vector<16x128xf32>
    %29 = tpu.matmul %28, %10, %cst_14 {dimension_numbers = #tpu.dot_dimension_numbers<[1], [0], [0], [1], [0, 0, 1, 1], [], []>} : vector<16x128xbf16>, vector<128x128xbf16>, vector<16x128xf32> -> vector<16x128xf32>
    %30 = vector.broadcast %11 : vector<1x128xf32> to vector<16x128xf32>
    %31 = arith.addf %29, %30 : vector<16x128xf32>
    %c0_15 = arith.constant 0 : index
    %c0_16 = arith.constant 0 : index
    %32 = vector.load %arg6[%c0_15, %c0_16] : memref<128x128xbf16, #tpu.memory_space<vmem>>, vector<128x128xbf16>
    %c0_17 = arith.constant 0 : index
    %c0_18 = arith.constant 0 : index
    %33 = vector.load %arg7[%c0_17, %c0_18] : memref<1x128xf32, #tpu.memory_space<vmem>>, vector<1x128xf32>
    %34 = arith.negf %27 : vector<16x128xf32>
    %35 = math.exp %34 : vector<16x128xf32>
    %cst_19 = arith.constant 1.000000e+00 : f32
    %36 = vector.broadcast %cst_19 : f32 to vector<16x128xf32>
    %37 = arith.addf %36, %35 : vector<16x128xf32>
    %38 = arith.divf %36, %37 : vector<16x128xf32>
    %39 = arith.mulf %27, %38 : vector<16x128xf32>
    %40 = arith.negf %31 : vector<16x128xf32>
    %41 = math.exp %40 : vector<16x128xf32>
    %cst_20 = arith.constant 1.000000e+00 : f32
    %42 = vector.broadcast %cst_20 : f32 to vector<16x128xf32>
    %43 = arith.addf %42, %41 : vector<16x128xf32>
    %44 = arith.divf %42, %43 : vector<16x128xf32>
    %45 = arith.mulf %31, %44 : vector<16x128xf32>
    %46 = arith.truncf %39 : vector<16x128xf32> to vector<16x128xbf16>
    %cst_21 = arith.constant dense<0.000000e+00> : vector<16x128xf32>
    %47 = tpu.matmul %46, %32, %cst_21 {dimension_numbers = #tpu.dot_dimension_numbers<[1], [0], [0], [1], [0, 0, 1, 1], [], []>} : vector<16x128xbf16>, vector<128x128xbf16>, vector<16x128xf32> -> vector<16x128xf32>
    %48 = vector.broadcast %33 : vector<1x128xf32> to vector<16x128xf32>
    %49 = arith.addf %47, %48 : vector<16x128xf32>
    %50 = arith.truncf %45 : vector<16x128xf32> to vector<16x128xbf16>
    %cst_22 = arith.constant dense<0.000000e+00> : vector<16x128xf32>
    %51 = tpu.matmul %50, %32, %cst_22 {dimension_numbers = #tpu.dot_dimension_numbers<[1], [0], [0], [1], [0, 0, 1, 1], [], []>} : vector<16x128xbf16>, vector<128x128xbf16>, vector<16x128xf32> -> vector<16x128xf32>
    %52 = vector.broadcast %33 : vector<1x128xf32> to vector<16x128xf32>
    %53 = arith.addf %51, %52 : vector<16x128xf32>
    %c0_23 = arith.constant 0 : index
    %c0_24 = arith.constant 0 : index
    %54 = vector.load %arg8[%c0_23, %c0_24] : memref<128x128xbf16, #tpu.memory_space<vmem>>, vector<128x128xbf16>
    %c0_25 = arith.constant 0 : index
    %c0_26 = arith.constant 0 : index
    %55 = vector.load %arg9[%c0_25, %c0_26] : memref<1x128xf32, #tpu.memory_space<vmem>>, vector<1x128xf32>
    %56 = arith.negf %49 : vector<16x128xf32>
    %57 = math.exp %56 : vector<16x128xf32>
    %cst_27 = arith.constant 1.000000e+00 : f32
    %58 = vector.broadcast %cst_27 : f32 to vector<16x128xf32>
    %59 = arith.addf %58, %57 : vector<16x128xf32>
    %60 = arith.divf %58, %59 : vector<16x128xf32>
    %61 = arith.mulf %49, %60 : vector<16x128xf32>
    %62 = arith.negf %53 : vector<16x128xf32>
    %63 = math.exp %62 : vector<16x128xf32>
    %cst_28 = arith.constant 1.000000e+00 : f32
    %64 = vector.broadcast %cst_28 : f32 to vector<16x128xf32>
    %65 = arith.addf %64, %63 : vector<16x128xf32>
    %66 = arith.divf %64, %65 : vector<16x128xf32>
    %67 = arith.mulf %53, %66 : vector<16x128xf32>
    %68 = arith.truncf %61 : vector<16x128xf32> to vector<16x128xbf16>
    %cst_29 = arith.constant dense<0.000000e+00> : vector<16x128xf32>
    %69 = tpu.matmul %68, %54, %cst_29 {dimension_numbers = #tpu.dot_dimension_numbers<[1], [0], [0], [1], [0, 0, 1, 1], [], []>} : vector<16x128xbf16>, vector<128x128xbf16>, vector<16x128xf32> -> vector<16x128xf32>
    %70 = vector.broadcast %55 : vector<1x128xf32> to vector<16x128xf32>
    %71 = arith.addf %69, %70 : vector<16x128xf32>
    %72 = arith.truncf %67 : vector<16x128xf32> to vector<16x128xbf16>
    %cst_30 = arith.constant dense<0.000000e+00> : vector<16x128xf32>
    %73 = tpu.matmul %72, %54, %cst_30 {dimension_numbers = #tpu.dot_dimension_numbers<[1], [0], [0], [1], [0, 0, 1, 1], [], []>} : vector<16x128xbf16>, vector<128x128xbf16>, vector<16x128xf32> -> vector<16x128xf32>
    %74 = vector.broadcast %55 : vector<1x128xf32> to vector<16x128xf32>
    %75 = arith.addf %73, %74 : vector<16x128xf32>
    %c0_31 = arith.constant 0 : index
    %c0_32 = arith.constant 0 : index
    %76 = vector.load %arg10[%c0_31, %c0_32] : memref<128x128xbf16, #tpu.memory_space<vmem>>, vector<128x128xbf16>
    %c0_33 = arith.constant 0 : index
    %c0_34 = arith.constant 0 : index
    %77 = vector.load %arg11[%c0_33, %c0_34] : memref<1x128xf32, #tpu.memory_space<vmem>>, vector<1x128xf32>
    %78 = arith.negf %71 : vector<16x128xf32>
    %79 = math.exp %78 : vector<16x128xf32>
    %cst_35 = arith.constant 1.000000e+00 : f32
    %80 = vector.broadcast %cst_35 : f32 to vector<16x128xf32>
    %81 = arith.addf %80, %79 : vector<16x128xf32>
    %82 = arith.divf %80, %81 : vector<16x128xf32>
    %83 = arith.mulf %71, %82 : vector<16x128xf32>
    %84 = arith.negf %75 : vector<16x128xf32>
    %85 = math.exp %84 : vector<16x128xf32>
    %cst_36 = arith.constant 1.000000e+00 : f32
    %86 = vector.broadcast %cst_36 : f32 to vector<16x128xf32>
    %87 = arith.addf %86, %85 : vector<16x128xf32>
    %88 = arith.divf %86, %87 : vector<16x128xf32>
    %89 = arith.mulf %75, %88 : vector<16x128xf32>
    %90 = arith.truncf %83 : vector<16x128xf32> to vector<16x128xbf16>
    %cst_37 = arith.constant dense<0.000000e+00> : vector<16x128xf32>
    %91 = tpu.matmul %90, %76, %cst_37 {dimension_numbers = #tpu.dot_dimension_numbers<[1], [0], [0], [1], [0, 0, 1, 1], [], []>} : vector<16x128xbf16>, vector<128x128xbf16>, vector<16x128xf32> -> vector<16x128xf32>
    %92 = vector.broadcast %77 : vector<1x128xf32> to vector<16x128xf32>
    %93 = arith.addf %91, %92 : vector<16x128xf32>
    %94 = arith.truncf %89 : vector<16x128xf32> to vector<16x128xbf16>
    %cst_38 = arith.constant dense<0.000000e+00> : vector<16x128xf32>
    %95 = tpu.matmul %94, %76, %cst_38 {dimension_numbers = #tpu.dot_dimension_numbers<[1], [0], [0], [1], [0, 0, 1, 1], [], []>} : vector<16x128xbf16>, vector<128x128xbf16>, vector<16x128xf32> -> vector<16x128xf32>
    %96 = vector.broadcast %77 : vector<1x128xf32> to vector<16x128xf32>
    %97 = arith.addf %95, %96 : vector<16x128xf32>
    %98 = math.tanh %93 : vector<16x128xf32>
    %c0_39 = arith.constant 0 : index
    %c0_40 = arith.constant 0 : index
    %99 = vector.load %arg12[%c0_39, %c0_40] : memref<32x128xf32, #tpu.memory_space<vmem>>, vector<16x128xf32>
    tpu.vector_store %arg12[%c0_39, %c0_40], %98 {strides = array<i32>} : memref<32x128xf32, #tpu.memory_space<vmem>>, vector<16x128xf32>,
    %100 = math.tanh %97 : vector<16x128xf32>
    %c16_41 = arith.constant 16 : index
    %c0_42 = arith.constant 0 : index
    %101 = vector.load %arg12[%c16_41, %c0_42] : memref<32x128xf32, #tpu.memory_space<vmem>>, vector<16x128xf32>
    tpu.vector_store %arg12[%c16_41, %c0_42], %100 {strides = array<i32>} : memref<32x128xf32, #tpu.memory_space<vmem>>, vector<16x128xf32>,
    return
  }
  func.func @transform_0(%arg0: i32) -> (i32, i32) {
    %c0_i32 = arith.constant 0 : i32
    %c0_i32_0 = arith.constant 0 : i32
    return %arg0, %c0_i32 : i32, i32
  }
  func.func @transform_1(%arg0: i32) -> (i32, i32) {
    %c0_i32 = arith.constant 0 : i32
    %c0_i32_0 = arith.constant 0 : i32
    %c0_i32_1 = arith.constant 0 : i32
    return %c0_i32, %c0_i32_0 : i32, i32
  }
  func.func @transform_2(%arg0: i32) -> (i32, i32) {
    %c0_i32 = arith.constant 0 : i32
    %c0_i32_0 = arith.constant 0 : i32
    %c0_i32_1 = arith.constant 0 : i32
    return %c0_i32, %c0_i32_0 : i32, i32
  }
  func.func @transform_3(%arg0: i32) -> (i32, i32) {
    %c0_i32 = arith.constant 0 : i32
    %c0_i32_0 = arith.constant 0 : i32
    %c0_i32_1 = arith.constant 0 : i32
    return %c0_i32, %c0_i32_0 : i32, i32
  }
  func.func @transform_4(%arg0: i32) -> (i32, i32) {
    %c0_i32 = arith.constant 0 : i32
    %c0_i32_0 = arith.constant 0 : i32
    %c0_i32_1 = arith.constant 0 : i32
    return %c0_i32, %c0_i32_0 : i32, i32
  }
  func.func @transform_5(%arg0: i32) -> (i32, i32) {
    %c0_i32 = arith.constant 0 : i32
    %c0_i32_0 = arith.constant 0 : i32
    %c0_i32_1 = arith.constant 0 : i32
    return %c0_i32, %c0_i32_0 : i32, i32
  }
  func.func @transform_6(%arg0: i32) -> (i32, i32) {
    %c0_i32 = arith.constant 0 : i32
    %c0_i32_0 = arith.constant 0 : i32
    %c0_i32_1 = arith.constant 0 : i32
    return %c0_i32, %c0_i32_0 : i32, i32
  }
  func.func @transform_7(%arg0: i32) -> (i32, i32) {
    %c0_i32 = arith.constant 0 : i32
    %c0_i32_0 = arith.constant 0 : i32
    %c0_i32_1 = arith.constant 0 : i32
    return %c0_i32, %c0_i32_0 : i32, i32
  }
  func.func @transform_8(%arg0: i32) -> (i32, i32) {
    %c0_i32 = arith.constant 0 : i32
    %c0_i32_0 = arith.constant 0 : i32
    %c0_i32_1 = arith.constant 0 : i32
    return %c0_i32, %c0_i32_0 : i32, i32
  }
  func.func @transform_9(%arg0: i32) -> (i32, i32) {
    %c0_i32 = arith.constant 0 : i32
    %c0_i32_0 = arith.constant 0 : i32
    %c0_i32_1 = arith.constant 0 : i32
    return %c0_i32, %c0_i32_0 : i32, i32
  }
  func.func @transform_10(%arg0: i32) -> (i32, i32) {
    %c0_i32 = arith.constant 0 : i32
    %c0_i32_0 = arith.constant 0 : i32
    %c0_i32_1 = arith.constant 0 : i32
    return %c0_i32, %c0_i32_0 : i32, i32
  }
  func.func @transform_11(%arg0: i32) -> (i32, i32) {
    %c0_i32 = arith.constant 0 : i32
    %c0_i32_0 = arith.constant 0 : i32
    return %arg0, %c0_i32 : i32, i32
  }
}

</mosaic_0001>

<bundles_post_ra>
// kernel: tpu_custom_call.1
= control target key start
LH: loop header
LB: loop body
LE: loop exit
PB: predicated region body
PF: predicated region fallthrough
CT: control target
= control target key end

     0   :  { %16 = vsyncpa [#allocation3], 0  ;;  %s1693_s0 = inlined_call_operand.hbm [shape: bf16[32,128], index: 0, kind: input, shape index: {}]   ;;  %s1694_s1 = inlined_call_operand.hbm [shape: bf16[128,128], index: 1, kind: input, shape index: {}]   ;;  %s1695_s2 = inlined_call_operand.vmem [shape: f32[1,128], index: 2, kind: input, shape index: {}]   ;;  %s1696_s3 = inlined_call_operand.hbm [shape: bf16[128,128], index: 3, kind: input, shape index: {}]   ;;  %s1697_s4 = inlined_call_operand.vmem [shape: f32[1,128], index: 4, kind: input, shape index: {}]   ;;  %s1698_s5 = inlined_call_operand.hbm [shape: bf16[128,128], index: 5, kind: input, shape index: {}]   ;;  %s1699_s6 = inlined_call_operand.vmem [shape: f32[1,128], index: 6, kind: input, shape index: {}]   ;;  %s1700_s7 = inlined_call_operand.hbm [shape: bf16[128,128], index: 7, kind: input, shape index: {}]   ;;  %s1701_s8 = inlined_call_operand.vmem [shape: f32[1,128], index: 8, kind: input, shape index: {}]   ;;  %s1702_s9 = inlined_call_operand.hbm [shape: bf16[128,128], index: 9, kind: input, shape index: {}]   ;;  %s1703_s10 = inlined_call_operand.vmem [shape: f32[1,128], index: 10, kind: input, shape index: {}]   ;;  %s1704_s11 = inlined_call_operand.hbm [shape: f32[32,128], index: 11, kind: output, shape index: {}]  }
   0x1   :  { %17 = vsyncpa [#allocation6], 0 }
   0x2   :  { %18 = vsyncpa [#allocation9], 0 }
   0x3   :  { %19 = vsyncpa [#allocation12], 0 }
   0x4   :  { %20 = vsyncpa [#allocation4], 0  ;;  %s38_s19 = sshll.u32 %s1694_s1, 4  ;;  %s1479_s20 = smov [#allocation5]   ;;  %s39_s19 = int_to_ptr.hbm [resolvable:$true] %s38_s19 }
   0x5   :  { %s40_s21 = sshll.u32 %s1479_s20, 4  ;;  %s68_s24 = sshll.u32 %s1698_s5, 4  ;;  %s41_s21 = int_to_ptr.vmem [resolvable:$true] %s40_s21  ;;  %s69_s24 = int_to_ptr.hbm [resolvable:$true] %s68_s24 }
   0x6   :  { %s1480_s25 = smov 64   ;;  %s1481_s26 = smov 4  }
   0x7   :  { %46 = dma.hbm_to_vmem [thread:$0]  %s39_s19, 1024, %s41_s21, [#allocation6], %s1480_s25, %s1480_s25, %s1481_s26  }
   0x8   :  { %s1482_s27 = smov [#allocation8]   ;;  %s25_s1 = sshll.u32 %s1693_s0, 4  ;;  %s26_s1 = int_to_ptr.hbm [resolvable:$true] %s25_s1 }
   0x9   :  { %s70_s28 = sshll.u32 %s1482_s27, 4  ;;  %s53_s13 = sshll.u32 %s1696_s3, 4  ;;  %s71_s28 = int_to_ptr.vmem [resolvable:$true] %s70_s28  ;;  %s54_s13 = int_to_ptr.hbm [resolvable:$true] %s53_s13 }
   0xa   :  { %76 = dma.hbm_to_vmem [thread:$0]  %s69_s24, 1024, %s71_s28, [#allocation9], %s1480_s25, %s1480_s25, %s1481_s26  }
   0xb   :  { %s1483_s14 = smov [#allocation2]   ;;  %s1484_s16 = smov [#allocation7]  }
   0xc   :  { %s27_s15 = sshll.u32 %s1483_s14, 4  ;;  %s55_s0 = sshll.u32 %s1484_s16, 4  ;;  %s28_s15 = int_to_ptr.vmem [resolvable:$true] %s27_s15  ;;  %s56_s0 = int_to_ptr.vmem [resolvable:$true] %s55_s0 }
   0xd   :  { %33 = dma.hbm_to_vmem [thread:$0]  %s26_s1, 256, %s28_s15, [#allocation3], %s1480_s25, %s1480_s25, %s1481_s26  }
   0xe   :  { %s83_s19 = sshll.u32 %s1700_s7, 4  ;;  %s98_s21 = sshll.u32 %s1702_s9, 4  ;;  %s84_s19 = int_to_ptr.hbm [resolvable:$true] %s83_s19  ;;  %s99_s21 = int_to_ptr.hbm [resolvable:$true] %s98_s21 }
   0xf   :  { %61 = dma.hbm_to_vmem [thread:$0]  %s54_s13, 1024, %s56_s0, [#allocation6], %s1480_s25, %s1480_s25, %s1481_s26  }
  0x10   :  { %s1485_s22 = smov [#allocation10]   ;;  %s1486_s24 = smov [#allocation11]  }
  0x11   :  { %s85_s23 = sshll.u32 %s1485_s22, 4  ;;  %s100_s7 = sshll.u32 %s1486_s24, 4  ;;  %s86_s23 = int_to_ptr.vmem [resolvable:$true] %s85_s23  ;;  %s101_s7 = int_to_ptr.vmem [resolvable:$true] %s100_s7 }
  0x12   :  { %91 = dma.hbm_to_vmem [thread:$0]  %s84_s19, 1024, %s86_s23, [#allocation9], %s1480_s25, %s1480_s25, %s1481_s26  }
  0x13   :  { %106 = dma.hbm_to_vmem [thread:$0]  %s99_s21, 1024, %s101_s7, [#allocation12], %s1480_s25, %s1480_s25, %s1481_s26  }
  0x14   :  { %1469 = dma.done.wait [#allocation3], 256  }
  0x15   :  { %1470 = vsyncadd [#allocation3], 4294967040 }
  0x16   :  { %1471 = dma.done.wait [#allocation6], 2048  }
  0x17   :  { %1472 = vsyncadd [#allocation6], 4294965248 }
  0x18   :  { %1473 = dma.done.wait [#allocation9], 2048  }
  0x19   :  { %1474 = vsyncadd [#allocation9], 4294965248 }
  0x1a   :  { %1475 = dma.done.wait [#allocation12], 1024  }
  0x1b   :  { %1476 = vsyncadd [#allocation12], 4294966272  ;;  %v1180_v0 = vld [vmem:[#allocation5 + $0x38] sm:$0xff]  ;;  %v1179_v1 = vld [vmem:[#allocation5 + $0x30] sm:$0xff]  ;;  %s1487_s30 = smov [#allocation13]   ;;  %s971_s12 = sshll.u32 %s1704_s11, 4  ;;  %s972_s12 = int_to_ptr.hbm [resolvable:$true] %s971_s12 }
  0x1c   :  { %211 = vmatpush.bf16.msra.mxu0 %v1180_v0  ;;  %231 = vmatpush.bf16.msra.mxu1 %v1180_v0  ;;  %v1178_v2 = vld [vmem:[#allocation5 + $0x28] sm:$0xff]  ;;  %v1177_v3 = vld [vmem:[#allocation5 + $0x20] sm:$0xff]  ;;  %v1176_v4 = vld [vmem:[#allocation5 + $0x18] sm:$0xff]  ;;  %s1488_s13 = smov 128   ;;  %s1489_s14 = smov 8  }
  0x1d   :  { %v1175_v5 = vld [vmem:[#allocation5 + $0x10] sm:$0xff]  ;;  %v1174_v6 = vld [vmem:[#allocation5 + $0x8] sm:$0xff]  ;;  %v1173_v7 = vld [vmem:[#allocation5] sm:$0xff] }
  0x1e   :  { %v1171_v8 = vld [vmem:[#allocation2] sm:$0xff]  ;;  %v1172_v9 = vld [vmem:[#allocation2 + $0x8] sm:$0xff]  ;;  %v1186_v12 = vld [vmem:[#allocation7 + $0x28] sm:$0xff] }
  0x1f   :  { %v1188_v10 = vld [vmem:[#allocation7 + $0x38] sm:$0xff]  ;;  %v1187_v11 = vld [vmem:[#allocation7 + $0x30] sm:$0xff]  ;;  %v1185_v13 = vld [vmem:[#allocation7 + $0x20] sm:$0xff] }
  0x20   :  { %212 = vmatpush.bf16.msra.mxu0 %v1179_v1  ;;  %232 = vmatpush.bf16.msra.mxu1 %v1179_v1  ;;  %v1224_v14 = vld [vmem:[%s1695_s2] ss:$0 sm:$0xff]  ;;  %v1184_v15 = vld [vmem:[#allocation7 + $0x18] sm:$0xff]  ;;  %v1182_v23 = vld [vmem:[#allocation7 + $0x8] sm:$0xff] }
  0x21   :  { %394 = vmatpush.bf16.msra.mxu2 %v1188_v10  ;;  %409 = vmatpush.bf16.msra.mxu3 %v1188_v10  ;;  %v1183_v20 = vld [vmem:[#allocation7 + $0x10] sm:$0xff]  ;;  %v1181_v28 = vld [vmem:[#allocation7] sm:$0xff] }
  0x24   :  { %213 = vmatpush.bf16.msra.mxu0 %v1178_v2  ;;  %233 = vmatpush.bf16.msra.mxu1 %v1178_v2 }
  0x25   :  { %395 = vmatpush.bf16.msra.mxu2 %v1187_v11  ;;  %410 = vmatpush.bf16.msra.mxu3 %v1187_v11 }
  0x28   :  { %214 = vmatpush.bf16.msra.mxu0 %v1177_v3  ;;  %234 = vmatpush.bf16.msra.mxu1 %v1177_v3 }
  0x29   :  { %396 = vmatpush.bf16.msra.mxu2 %v1186_v12  ;;  %411 = vmatpush.bf16.msra.mxu3 %v1186_v12 }
  0x2c   :  { %215 = vmatpush.bf16.msra.mxu0 %v1176_v4  ;;  %235 = vmatpush.bf16.msra.mxu1 %v1176_v4 }
  0x2d   :  { %397 = vmatpush.bf16.msra.mxu2 %v1185_v13  ;;  %412 = vmatpush.bf16.msra.mxu3 %v1185_v13 }
  0x30   :  { %216 = vmatpush.bf16.msra.mxu0 %v1175_v5  ;;  %236 = vmatpush.bf16.msra.mxu1 %v1175_v5 }
  0x31   :  { %398 = vmatpush.bf16.msra.mxu2 %v1184_v15  ;;  %413 = vmatpush.bf16.msra.mxu3 %v1184_v15 }
  0x34   :  { %217 = vmatpush.bf16.msra.mxu0 %v1174_v6  ;;  %237 = vmatpush.bf16.msra.mxu1 %v1174_v6 }
  0x35   :  { %399 = vmatpush.bf16.msra.mxu2 %v1183_v20  ;;  %414 = vmatpush.bf16.msra.mxu3 %v1183_v20 }
  0x38   :  { %218 = vmatpush.bf16.msra.mxu0 %v1173_v7  ;;  %238 = vmatpush.bf16.msra.mxu1 %v1173_v7 }
  0x39   :  { %400 = vmatpush.bf16.msra.mxu2 %v1182_v23  ;;  %415 = vmatpush.bf16.msra.mxu3 %v1182_v23 }
  0x3b   :  { %219 = vmatmul.bf16.vlgmr.msra.gmra.mxu0 %v1171_v8  ;;  %239 = vmatmul.bf16.vlgmr.msra.gmra.mxu1 %v1172_v9 }
  0x3d   :  { %401 = vmatpush.bf16.msra.mxu2 %v1181_v28  ;;  %416 = vmatpush.bf16.msra.mxu3 %v1181_v28  ;;  %v1193_v28 = vld [vmem:[#allocation8 + $0x20] sm:$0xff] }
  0xb8   :  { %v220_v16 = vpop.f32.mrf.mxu0  ;;  %v240_v17 = vpop.f32.mrf.mxu1 }
  0xb9   :  { %v1589_v18 = vadd.f32 %v1224_v14, %v220_v16  ;;  %v1591_v19 = vadd.f32 %v1224_v14, %v240_v17 }
  0xbb   :  { %v1027_v21 = vmul.f32 -1.442695, %v1589_v18  ;;  %v1029_v22 = vmul.f32 -1.442695, %v1591_v19 }
  0xbd   :  { %1229 = vpow2.f32 %v1027_v21 }
  0xbe   :  { %1231 = vpow2.f32 %v1029_v22 }
  0xc0   :  { %v222_v24 = vpop.f32.mrf.mxu0  ;;  %v242_v25 = vpop.f32.mrf.mxu1 }
  0xc1   :  { %v1595_v26 = vadd.f32 %v1224_v14, %v222_v24  ;;  %v1597_v27 = vadd.f32 %v1224_v14, %v242_v25  ;;  %v1196_v25 = vld [vmem:[#allocation8 + $0x38] sm:$0xff] }
  0xc2   :  { %572 = vmatpush.bf16.msrb.mxu0 %v1196_v25  ;;  %587 = vmatpush.bf16.msrb.mxu1 %v1196_v25 }
  0xc3   :  { %v1230_v29 = vpop.eup %1229  ;;  %v1028_v30 = vmul.f32 -1.442695, %v1595_v26  ;;  %v1030_v33 = vmul.f32 -1.442695, %v1597_v27 }
  0xc4   :  { %v1232_v31 = vpop.eup %1231  ;;  %v268_v32 = vadd.f32 1.0, %v1230_v29  ;;  %v1225_v29 = vld [vmem:[%s1697_s4] ss:$0 sm:$0xff] }
  0xc5   :  { %v308_v34 = vadd.f32 1.0, %v1232_v31  ;;  %1233 = vpow2.f32 %v1028_v30 }
  0xc6   :  { %1235 = vrcp.f32 %v268_v32  ;;  %vm275_vm1 = vweird.f32 %v268_v32  ;;  %v279_v50 = vand.u32 2147483647, %v268_v32  ;;  %v281_v51 = vand.u32 2147483648, %v268_v32 }
  0xc7   :  { %1237 = vrcp.f32 %v308_v34  ;;  %vm315_vm2 = vweird.f32 %v308_v34  ;;  %v319_v53 = vand.u32 2147483647, %v308_v34  ;;  %v321_v58 = vand.u32 2147483648, %v308_v34 }
  0xc8   :  { %1239 = vpow2.f32 %v1030_v33  ;;  %vm280_vm6 = vcmp.eq.f32.partialorder %v279_v50, 8.507059e+37  ;;  %v282_v63 = vor.u32 1.1754944e-38, %v281_v51 }
  0xc9   :  { %v322_v9 = vor.u32 1.1754944e-38, %v321_v58  ;;  %vm320_vm12 = vcmp.eq.f32.partialorder %v319_v53, 8.507059e+37 }
  0xcb   :  { %v1234_v35 = vpop.eup %1233 }
  0xcc   :  { %v1236_v36 = vpop.eup %1235  ;;  %v269_v37 = vadd.f32 1.0, %v1234_v35 }
  0xcd   :  { %v1238_v38 = vpop.eup %1237  ;;  %v271_v39 = vmul.f32 %v1236_v36, %v268_v32  ;;  %vm276_vm0 = vweird.f32 %v1236_v36 }
  0xce   :  { %v1240_v40 = vpop.eup %1239  ;;  %v311_v41 = vmul.f32 %v1238_v38, %v308_v34  ;;  %1241 = vrcp.f32 %v269_v37  ;;  %v296_v55 = vand.u32 2147483648, %v269_v37  ;;  %vm1601_vm3 = vmor %vm275_vm1, %vm276_vm0  ;;  %vm316_vm4 = vweird.f32 %v1238_v38  ;;  %v1191_v34 = vld [vmem:[#allocation8 + $0x10] sm:$0xff] }
  0xcf   :  { %v272_v42 = vsub.f32 1.0, %v271_v39  ;;  %v309_v43 = vadd.f32 1.0, %v1240_v40  ;;  %v294_v62 = vand.u32 2147483647, %v269_v37  ;;  %vm290_vm7 = vweird.f32 %v269_v37  ;;  %vm1608_vm8 = vmor %vm315_vm2, %vm316_vm4 }
  0xd0   :  { %v312_v44 = vsub.f32 1.0, %v311_v41  ;;  %v297_v3 = vor.u32 1.1754944e-38, %v296_v55 }
  0xd1   :  { %v273_v45 = vmul.f32 %v1236_v36, %v272_v42  ;;  %1243 = vrcp.f32 %v309_v43  ;;  %v334_v4 = vand.u32 2147483647, %v309_v43  ;;  %v336_v5 = vand.u32 2147483648, %v309_v43 }
  0xd2   :  { %v313_v47 = vmul.f32 %v1238_v38, %v312_v44  ;;  %vm295_vm11 = vcmp.eq.f32.partialorder %v294_v62, 8.507059e+37  ;;  %vm330_vm13 = vweird.f32 %v309_v43  ;;  %v1189_v44 = vld [vmem:[#allocation8] sm:$0xff] }
  0xd3   :  { %v274_v48 = vadd.f32 %v1236_v36, %v273_v45  ;;  %v337_v16 = vor.u32 1.1754944e-38, %v336_v5  ;;  %vm335_vm15 = vcmp.eq.f32.partialorder %v334_v4, 8.507059e+37 }
  0xd4   :  { %v1242_v46 = vpop.eup %1241  ;;  %v314_v57 = vadd.f32 %v1238_v38, %v313_v47 }
  0xd5   :  { %v286_v49 = vmul.f32 %v1242_v46, %v269_v37  ;;  %v278_v60 = vsel %vm1601_vm3, %v1236_v36, %v274_v48  ;;  %vm291_vm5 = vweird.f32 %v1242_v46  ;;  %v1190_v37 = vld [vmem:[#allocation8 + $0x8] sm:$0xff] }
  0xd6   :  { %v283_v6 = vsel %vm280_vm6, %v282_v63, %v278_v60  ;;  %v318_v7 = vsel %vm1608_vm8, %v1238_v38, %v314_v57  ;;  %vm292_vm9 = vmor %vm290_vm7, %vm291_vm5 }
  0xd7   :  { %v1244_v52 = vpop.eup %1243  ;;  %v287_v54 = vsub.f32 1.0, %v286_v49  ;;  %v300_v13 = vmul.f32 %v283_v6, %v1589_v18  ;;  %v323_v14 = vsel %vm320_vm12, %v322_v9, %v318_v7  ;;  %v1195_v18 = vld [vmem:[#allocation8 + $0x30] sm:$0xff] }
  0xd8   :  { %v326_v59 = vmul.f32 %v1244_v52, %v309_v43  ;;  %vm331_vm10 = vweird.f32 %v1244_v52  ;;  %v340_v22 = vmul.f32 %v323_v14, %v1591_v19  ;;  %573 = vmatpush.bf16.msrb.mxu0 %v1195_v18  ;;  %588 = vmatpush.bf16.msrb.mxu1 %v1195_v18 }
  0xd9   :  { %v288_v61 = vmul.f32 %v1242_v46, %v287_v54  ;;  %vm332_vm14 = vmor %vm330_vm13, %vm331_vm10 }
  0xda   :  { %v327_v0 = vsub.f32 1.0, %v326_v59 }
  0xdb   :  { %v289_v2 = vadd.f32 %v1242_v46, %v288_v61 }
  0xdc   :  { %v328_v8 = vmul.f32 %v1244_v52, %v327_v0 }
  0xdd   :  { %v293_v10 = vsel %vm292_vm9, %v1242_v46, %v289_v2 }
  0xde   :  { %v298_v11 = vsel %vm295_vm11, %v297_v3, %v293_v10  ;;  %v329_v12 = vadd.f32 %v1244_v52, %v328_v8 }
  0xdf   :  { %v301_v15 = vmul.f32 %v298_v11, %v1595_v26  ;;  %v1194_v26 = vld [vmem:[#allocation8 + $0x28] sm:$0xff] }
  0xe0   :  { %v333_v17 = vsel %vm332_vm14, %v1244_v52, %v329_v12  ;;  %574 = vmatpush.bf16.msrb.mxu0 %v1194_v26  ;;  %589 = vmatpush.bf16.msrb.mxu1 %v1194_v26 }
  0xe1   :  { %v338_v20 = vsel %vm335_vm15, %v337_v16, %v333_v17  ;;  %v342_v21 = vpack.c.bf16 %v301_v15, %v300_v13 }
  0xe2   :  { %v341_v23 = vmul.f32 %v338_v20, %v1597_v27  ;;  %v1192_v27 = vld [vmem:[#allocation8 + $0x18] sm:$0xff] }
  0xe3   :  { %402 = vmatmul.bf16.vlgmr.msra.gmra.mxu2 %v342_v21 }
  0xe4   :  { %v408_v24 = vpack.c.bf16 %v341_v23, %v340_v22  ;;  %575 = vmatpush.bf16.msrb.mxu0 %v1193_v28  ;;  %590 = vmatpush.bf16.msrb.mxu1 %v1193_v28 }
  0xe6   :  { %417 = vmatmul.bf16.vlgmr.msra.gmra.mxu3 %v408_v24 }
  0xe8   :  { %576 = vmatpush.bf16.msrb.mxu0 %v1192_v27  ;;  %591 = vmatpush.bf16.msrb.mxu1 %v1192_v27 }
  0xec   :  { %577 = vmatpush.bf16.msrb.mxu0 %v1191_v34  ;;  %592 = vmatpush.bf16.msrb.mxu1 %v1191_v34 }
  0xf0   :  { %578 = vmatpush.bf16.msrb.mxu0 %v1190_v37  ;;  %593 = vmatpush.bf16.msrb.mxu1 %v1190_v37 }
  0xf4   :  { %579 = vmatpush.bf16.msrb.mxu0 %v1189_v44  ;;  %594 = vmatpush.bf16.msrb.mxu1 %v1189_v44  ;;  %v1200_v44 = vld [vmem:[#allocation10 + $0x18] sm:$0xff] }
 0x166   :  { %v403_v19 = vpop.f32.mrf.mxu2 }
 0x167   :  { %v1621_v30 = vadd.f32 %v1225_v29, %v403_v19 }
 0x169   :  { %v1063_v31 = vmul.f32 -1.442695, %v1621_v30  ;;  %v418_v32 = vpop.f32.mrf.mxu3 }
 0x16a   :  { %v1624_v33 = vadd.f32 %v1225_v29, %v418_v32 }
 0x16b   :  { %1245 = vpow2.f32 %v1063_v31 }
 0x16c   :  { %v1065_v35 = vmul.f32 -1.442695, %v1624_v33 }
 0x16e   :  { %1247 = vpow2.f32 %v1065_v35  ;;  %v405_v36 = vpop.f32.mrf.mxu2 }
 0x16f   :  { %v1627_v38 = vadd.f32 %v1225_v29, %v405_v36 }
 0x171   :  { %v1246_v39 = vpop.eup %1245  ;;  %v1064_v40 = vmul.f32 -1.442695, %v1627_v38  ;;  %v420_v41 = vpop.f32.mrf.mxu3 }
 0x172   :  { %v446_v42 = vadd.f32 1.0, %v1246_v39  ;;  %v1630_v43 = vadd.f32 %v1225_v29, %v420_v41  ;;  %v1202_v39 = vld [vmem:[#allocation10 + $0x28] sm:$0xff]  ;;  %v1201_v41 = vld [vmem:[#allocation10 + $0x20] sm:$0xff] }
 0x173   :  { %1249 = vpow2.f32 %v1064_v40  ;;  %v1226_v40 = vld [vmem:[%s1699_s6] ss:$0 sm:$0xff] }
 0x174   :  { %v1248_v45 = vpop.eup %1247  ;;  %1251 = vrcp.f32 %v446_v42  ;;  %v1066_v47 = vmul.f32 -1.442695, %v1630_v43  ;;  %v457_v60 = vand.u32 2147483647, %v446_v42  ;;  %v459_v63 = vand.u32 2147483648, %v446_v42 }
 0x175   :  { %v486_v46 = vadd.f32 1.0, %v1248_v45  ;;  %vm453_vm1 = vweird.f32 %v446_v42 }
 0x176   :  { %vm458_vm3 = vcmp.eq.f32.partialorder %v457_v60, 8.507059e+37  ;;  %v460_v8 = vor.u32 1.1754944e-38, %v459_v63 }
 0x177   :  { %1253 = vrcp.f32 %v486_v46  ;;  %vm493_vm6 = vweird.f32 %v486_v46  ;;  %v499_v11 = vand.u32 2147483648, %v486_v46  ;;  %v497_v14 = vand.u32 2147483647, %v486_v46 }
 0x178   :  { %1255 = vpow2.f32 %v1066_v47  ;;  %v1199_v47 = vld [vmem:[#allocation10 + $0x10] sm:$0xff] }
 0x179   :  { %v1250_v48 = vpop.eup %1249  ;;  %v500_v26 = vor.u32 1.1754944e-38, %v499_v11  ;;  %vm498_vm12 = vcmp.eq.f32.partialorder %v497_v14, 8.507059e+37 }
 0x17a   :  { %v1252_v49 = vpop.eup %1251  ;;  %v447_v50 = vadd.f32 1.0, %v1250_v48 }
 0x17b   :  { %v449_v51 = vmul.f32 %v1252_v49, %v446_v42  ;;  %vm454_vm0 = vweird.f32 %v1252_v49 }
 0x17c   :  { %1257 = vrcp.f32 %v447_v50  ;;  %vm1633_vm2 = vmor %vm453_vm1, %vm454_vm0  ;;  %v474_v3 = vand.u32 2147483648, %v447_v50  ;;  %v472_v7 = vand.u32 2147483647, %v447_v50  ;;  %vm468_vm7 = vweird.f32 %v447_v50 }
 0x17d   :  { %v1254_v52 = vpop.eup %1253  ;;  %v450_v53 = vsub.f32 1.0, %v449_v51 }
 0x17e   :  { %v1256_v54 = vpop.eup %1255  ;;  %v489_v55 = vmul.f32 %v1254_v52, %v486_v46  ;;  %vm494_vm5 = vweird.f32 %v1254_v52  ;;  %v475_v15 = vor.u32 1.1754944e-38, %v474_v3  ;;  %vm473_vm10 = vcmp.eq.f32.partialorder %v472_v7, 8.507059e+37 }
 0x17f   :  { %v451_v56 = vmul.f32 %v1252_v49, %v450_v53  ;;  %v487_v57 = vadd.f32 1.0, %v1256_v54  ;;  %vm1639_vm9 = vmor %vm493_vm6, %vm494_vm5  ;;  %v1198_v53 = vld [vmem:[#allocation10 + $0x8] sm:$0xff] }
 0x180   :  { %v490_v58 = vsub.f32 1.0, %v489_v55 }
 0x181   :  { %1259 = vrcp.f32 %v487_v57  ;;  %v452_v61 = vadd.f32 %v1252_v49, %v451_v56  ;;  %v512_v21 = vand.u32 2147483647, %v487_v57  ;;  %v514_v22 = vand.u32 2147483648, %v487_v57  ;;  %v1197_v56 = vld [vmem:[#allocation10] sm:$0xff] }
 0x182   :  { %v1258_v59 = vpop.eup %1257  ;;  %v491_v0 = vmul.f32 %v1254_v52, %v490_v58  ;;  %vm508_vm13 = vweird.f32 %v487_v57 }
 0x183   :  { %v464_v62 = vmul.f32 %v1258_v59, %v447_v50  ;;  %v456_v5 = vsel %vm1633_vm2, %v1252_v49, %v452_v61  ;;  %vm469_vm4 = vweird.f32 %v1258_v59  ;;  %v515_v27 = vor.u32 1.1754944e-38, %v514_v22 }
 0x184   :  { %v492_v9 = vadd.f32 %v1254_v52, %v491_v0  ;;  %v461_v13 = vsel %vm458_vm3, %v460_v8, %v456_v5  ;;  %vm470_vm8 = vmor %vm468_vm7, %vm469_vm4  ;;  %vm513_vm15 = vcmp.eq.f32.partialorder %v512_v21, 8.507059e+37 }
 0x185   :  { %v465_v1 = vsub.f32 1.0, %v464_v62  ;;  %v478_v18 = vmul.f32 %v461_v13, %v1621_v30  ;;  %v1204_v30 = vld [vmem:[#allocation10 + $0x38] sm:$0xff] }
 0x186   :  { %v496_v23 = vsel %vm1639_vm9, %v1254_v52, %v492_v9  ;;  %750 = vmatpush.bf16.msrb.mxu2 %v1204_v30  ;;  %765 = vmatpush.bf16.msrb.mxu3 %v1204_v30 }
 0x187   :  { %v1260_v4 = vpop.eup %1259  ;;  %v466_v6 = vmul.f32 %v1258_v59, %v465_v1  ;;  %v501_v19 = vsel %vm498_vm12, %v500_v26, %v496_v23 }
 0x188   :  { %v504_v10 = vmul.f32 %v1260_v4, %v487_v57  ;;  %vm509_vm11 = vweird.f32 %v1260_v4  ;;  %v518_v35 = vmul.f32 %v501_v19, %v1624_v33 }
 0x189   :  { %v467_v12 = vadd.f32 %v1258_v59, %v466_v6  ;;  %vm510_vm14 = vmor %vm508_vm13, %vm509_vm11 }
 0x18a   :  { %v505_v16 = vsub.f32 1.0, %v504_v10 }
 0x18b   :  { %v471_v20 = vsel %vm470_vm8, %v1258_v59, %v467_v12 }
 0x18c   :  { %v476_v24 = vsel %vm473_vm10, %v475_v15, %v471_v20  ;;  %v506_v25 = vmul.f32 %v1260_v4, %v505_v16 }
 0x18d   :  { %v479_v28 = vmul.f32 %v476_v24, %v1627_v38  ;;  %v1203_v38 = vld [vmem:[#allocation10 + $0x30] sm:$0xff] }
 0x18e   :  { %v507_v29 = vadd.f32 %v1260_v4, %v506_v25  ;;  %751 = vmatpush.bf16.msrb.mxu2 %v1203_v38  ;;  %766 = vmatpush.bf16.msrb.mxu3 %v1203_v38 }
 0x18f   :  { %v520_v31 = vpack.c.bf16 %v479_v28, %v478_v18 }
 0x190   :  { %v511_v32 = vsel %vm510_vm14, %v1260_v4, %v507_v29 }
 0x191   :  { %v516_v34 = vsel %vm513_vm15, %v515_v27, %v511_v32  ;;  %580 = vmatmul.bf16.vlgmr.msrb.gmra.mxu0 %v520_v31 }
 0x192   :  { %v519_v36 = vmul.f32 %v516_v34, %v1630_v43  ;;  %752 = vmatpush.bf16.msrb.mxu2 %v1202_v39  ;;  %767 = vmatpush.bf16.msrb.mxu3 %v1202_v39 }
 0x194   :  { %v586_v37 = vpack.c.bf16 %v519_v36, %v518_v35 }
 0x196   :  { %595 = vmatmul.bf16.vlgmr.msrb.gmra.mxu1 %v586_v37  ;;  %753 = vmatpush.bf16.msrb.mxu2 %v1201_v41 }
 0x197   :  { %768 = vmatpush.bf16.msrb.mxu3 %v1201_v41 }
 0x19a   :  { %754 = vmatpush.bf16.msrb.mxu2 %v1200_v44 }
 0x19b   :  { %769 = vmatpush.bf16.msrb.mxu3 %v1200_v44 }
 0x19e   :  { %755 = vmatpush.bf16.msrb.mxu2 %v1199_v47 }
 0x19f   :  { %770 = vmatpush.bf16.msrb.mxu3 %v1199_v47 }
 0x1a2   :  { %756 = vmatpush.bf16.msrb.mxu2 %v1198_v53 }
 0x1a3   :  { %771 = vmatpush.bf16.msrb.mxu3 %v1198_v53 }
 0x1a6   :  { %757 = vmatpush.bf16.msrb.mxu2 %v1197_v56 }
 0x1a7   :  { %772 = vmatpush.bf16.msrb.mxu3 %v1197_v56 }
 0x20e   :  { %v581_v42 = vpop.f32.mrf.mxu0 }
 0x20f   :  { %v1652_v33 = vadd.f32 %v1226_v40, %v581_v42 }
 0x211   :  { %v1099_v43 = vmul.f32 -1.442695, %v1652_v33 }
 0x213   :  { %1261 = vpow2.f32 %v1099_v43  ;;  %v596_v45 = vpop.f32.mrf.mxu1 }
 0x214   :  { %v1655_v46 = vadd.f32 %v1226_v40, %v596_v45 }
 0x216   :  { %v1101_v48 = vmul.f32 -1.442695, %v1655_v46  ;;  %v583_v49 = vpop.f32.mrf.mxu0 }
 0x217   :  { %v1658_v50 = vadd.f32 %v1226_v40, %v583_v49  ;;  %v1211_v49 = vld [vmem:[#allocation11 + $0x30] sm:$0xff] }
 0x218   :  { %1263 = vpow2.f32 %v1101_v48  ;;  %v1212_v48 = vld [vmem:[#allocation11 + $0x38] sm:$0xff] }
 0x219   :  { %v1262_v51 = vpop.eup %1261  ;;  %v1100_v52 = vmul.f32 -1.442695, %v1658_v50  ;;  %928 = vmatpush.bf16.msra.mxu0 %v1212_v48  ;;  %943 = vmatpush.bf16.msra.mxu1 %v1212_v48 }
 0x21a   :  { %v624_v54 = vadd.f32 1.0, %v1262_v51  ;;  %v1227_v51 = vld [vmem:[%s1701_s8] ss:$0 sm:$0xff] }
 0x21b   :  { %1265 = vpow2.f32 %v1100_v52  ;;  %v598_v55 = vpop.f32.mrf.mxu1  ;;  %v1209_v52 = vld [vmem:[#allocation11 + $0x20] sm:$0xff] }
 0x21c   :  { %1267 = vrcp.f32 %v624_v54  ;;  %v1661_v57 = vadd.f32 %v1226_v40, %v598_v55  ;;  %v637_v11 = vand.u32 2147483648, %v624_v54  ;;  %vm631_vm1 = vweird.f32 %v624_v54  ;;  %v1208_v55 = vld [vmem:[#allocation11 + $0x18] sm:$0xff] }
 0x21d   :  { %v635_v12 = vand.u32 2147483647, %v624_v54  ;;  %929 = vmatpush.bf16.msra.mxu0 %v1211_v49  ;;  %944 = vmatpush.bf16.msra.mxu1 %v1211_v49 }
 0x21e   :  { %v1264_v58 = vpop.eup %1263  ;;  %v1102_v60 = vmul.f32 -1.442695, %v1661_v57  ;;  %v638_v21 = vor.u32 1.1754944e-38, %v637_v11 }
 0x21f   :  { %v664_v59 = vadd.f32 1.0, %v1264_v58  ;;  %vm636_vm4 = vcmp.eq.f32.partialorder %v635_v12, 8.507059e+37 }
 0x221   :  { %v1266_v61 = vpop.eup %1265  ;;  %1269 = vrcp.f32 %v664_v59  ;;  %v677_v28 = vand.u32 2147483648, %v664_v59  ;;  %vm671_vm9 = vweird.f32 %v664_v59  ;;  %v675_v19 = vand.u32 2147483647, %v664_v59 }
 0x222   :  { %v1268_v62 = vpop.eup %1267  ;;  %v625_v63 = vadd.f32 1.0, %v1266_v61  ;;  %1271 = vpow2.f32 %v1102_v60 }
 0x223   :  { %v627_v0 = vmul.f32 %v1268_v62, %v624_v54  ;;  %vm632_vm0 = vweird.f32 %v1268_v62  ;;  %v678_v38 = vor.u32 1.1754944e-38, %v677_v28  ;;  %vm676_vm12 = vcmp.eq.f32.partialorder %v675_v19, 8.507059e+37 }
 0x224   :  { %1273 = vrcp.f32 %v625_v63  ;;  %v652_v14 = vand.u32 2147483648, %v625_v63  ;;  %vm633_vm2 = vmor %vm631_vm1, %vm632_vm0  ;;  %v650_v20 = vand.u32 2147483647, %v625_v63  ;;  %vm646_vm5 = vweird.f32 %v625_v63 }
 0x225   :  { %v628_v1 = vsub.f32 1.0, %v627_v0  ;;  %v1206_v0 = vld [vmem:[#allocation11 + $0x8] sm:$0xff] }
 0x226   :  { %v653_v24 = vor.u32 1.1754944e-38, %v652_v14  ;;  %vm651_vm8 = vcmp.eq.f32.partialorder %v650_v20, 8.507059e+37 }
 0x227   :  { %v1270_v2 = vpop.eup %1269  ;;  %v629_v3 = vmul.f32 %v1268_v62, %v628_v1 }
 0x228   :  { %v1272_v4 = vpop.eup %1271  ;;  %v667_v5 = vmul.f32 %v1270_v2, %v664_v59  ;;  %vm672_vm6 = vweird.f32 %v1270_v2 }
 0x229   :  { %v665_v6 = vadd.f32 1.0, %v1272_v4  ;;  %v630_v9 = vadd.f32 %v1268_v62, %v629_v3  ;;  %vm673_vm10 = vmor %vm671_vm9, %vm672_vm6  ;;  %v1205_v3 = vld [vmem:[#allocation11] sm:$0xff] }
 0x22a   :  { %v1274_v7 = vpop.eup %1273  ;;  %v668_v8 = vsub.f32 1.0, %v667_v5 }
 0x22b   :  { %v642_v10 = vmul.f32 %v1274_v7, %v625_v63  ;;  %1275 = vrcp.f32 %v665_v6  ;;  %v634_v16 = vsel %vm633_vm2, %v1268_v62, %v630_v9  ;;  %vm647_vm3 = vweird.f32 %v1274_v7 }
 0x22c   :  { %v669_v15 = vmul.f32 %v1270_v2, %v668_v8  ;;  %v639_v25 = vsel %vm636_vm4, %v638_v21, %v634_v16  ;;  %vm648_vm7 = vmor %vm646_vm5, %vm647_vm3  ;;  %v692_v35 = vand.u32 2147483648, %v665_v6  ;;  %v690_v30 = vand.u32 2147483647, %v665_v6 }
 0x22d   :  { %v643_v13 = vsub.f32 1.0, %v642_v10  ;;  %v656_v32 = vmul.f32 %v639_v25, %v1652_v33  ;;  %vm686_vm13 = vweird.f32 %v665_v6 }
 0x22e   :  { %v670_v18 = vadd.f32 %v1270_v2, %v669_v15  ;;  %v693_v42 = vor.u32 1.1754944e-38, %v692_v35  ;;  %vm691_vm15 = vcmp.eq.f32.partialorder %v690_v30, 8.507059e+37 }
 0x22f   :  { %v644_v17 = vmul.f32 %v1274_v7, %v643_v13 }
 0x230   :  { %v674_v36 = vsel %vm673_vm10, %v1270_v2, %v670_v18 }
 0x231   :  { %v1276_v22 = vpop.eup %1275  ;;  %v645_v23 = vadd.f32 %v1274_v7, %v644_v17  ;;  %v679_v41 = vsel %vm676_vm12, %v678_v38, %v674_v36 }
 0x232   :  { %v682_v26 = vmul.f32 %v1276_v22, %v665_v6  ;;  %vm687_vm11 = vweird.f32 %v1276_v22  ;;  %v696_v44 = vmul.f32 %v679_v41, %v1655_v46 }
 0x233   :  { %v649_v29 = vsel %vm648_vm7, %v1274_v7, %v645_v23  ;;  %vm688_vm14 = vmor %vm686_vm13, %vm687_vm11 }
 0x234   :  { %v654_v27 = vsel %vm651_vm8, %v653_v24, %v649_v29  ;;  %v683_v31 = vsub.f32 1.0, %v682_v26 }
 0x235   :  { %v657_v34 = vmul.f32 %v654_v27, %v1658_v50  ;;  %v1210_v50 = vld [vmem:[#allocation11 + $0x28] sm:$0xff] }
 0x236   :  { %v684_v37 = vmul.f32 %v1276_v22, %v683_v31  ;;  %930 = vmatpush.bf16.msra.mxu0 %v1210_v50  ;;  %945 = vmatpush.bf16.msra.mxu1 %v1210_v50 }
 0x237   :  { %v698_v39 = vpack.c.bf16 %v657_v34, %v656_v32 }
 0x238   :  { %v685_v40 = vadd.f32 %v1276_v22, %v684_v37 }
 0x239   :  { %758 = vmatmul.bf16.vlgmr.msrb.gmra.mxu2 %v698_v39 }
 0x23a   :  { %v689_v43 = vsel %vm688_vm14, %v1276_v22, %v685_v40  ;;  %931 = vmatpush.bf16.msra.mxu0 %v1209_v52  ;;  %946 = vmatpush.bf16.msra.mxu1 %v1209_v52 }
 0x23b   :  { %v694_v33 = vsel %vm691_vm15, %v693_v42, %v689_v43 }
 0x23c   :  { %v697_v45 = vmul.f32 %v694_v33, %v1661_v57  ;;  %v1207_v57 = vld [vmem:[#allocation11 + $0x10] sm:$0xff] }
 0x23e   :  { %v764_v47 = vpack.c.bf16 %v697_v45, %v696_v44  ;;  %932 = vmatpush.bf16.msra.mxu0 %v1208_v55  ;;  %947 = vmatpush.bf16.msra.mxu1 %v1208_v55 }
 0x240   :  { %773 = vmatmul.bf16.vlgmr.msrb.gmra.mxu3 %v764_v47 }
 0x242   :  { %933 = vmatpush.bf16.msra.mxu0 %v1207_v57  ;;  %948 = vmatpush.bf16.msra.mxu1 %v1207_v57 }
 0x246   :  { %934 = vmatpush.bf16.msra.mxu0 %v1206_v0  ;;  %949 = vmatpush.bf16.msra.mxu1 %v1206_v0 }
 0x24a   :  { %935 = vmatpush.bf16.msra.mxu0 %v1205_v3  ;;  %950 = vmatpush.bf16.msra.mxu1 %v1205_v3 }
 0x2bc   :  { %v759_v53 = vpop.f32.mrf.mxu2 }
 0x2bd   :  { %v1671_v46 = vadd.f32 %v1227_v51, %v759_v53 }
 0x2bf   :  { %v1135_v54 = vmul.f32 -1.442695, %v1671_v46 }
 0x2c1   :  { %1277 = vpow2.f32 %v1135_v54 }
 0x2c3   :  { %v774_v56 = vpop.f32.mrf.mxu3 }
 0x2c4   :  { %v1674_v58 = vadd.f32 %v1227_v51, %v774_v56  ;;  %v761_v59 = vpop.f32.mrf.mxu2 }
 0x2c5   :  { %v1676_v60 = vadd.f32 %v1227_v51, %v761_v59  ;;  %v1228_v59 = vld [vmem:[%s1703_s10] ss:$0 sm:$0xff]  ;;  %s969_s10 = sshll.u32 %s1487_s30, 4  ;;  %s970_s10 = int_to_ptr.vmem [resolvable:$true] %s969_s10 }
 0x2c6   :  { %v1137_v61 = vmul.f32 -1.442695, %v1674_v58 }
 0x2c7   :  { %v1278_v62 = vpop.eup %1277  ;;  %v1136_v63 = vmul.f32 -1.442695, %v1676_v60 }
 0x2c8   :  { %v802_v1 = vadd.f32 1.0, %v1278_v62  ;;  %1279 = vpow2.f32 %v1137_v61 }
 0x2c9   :  { %1281 = vpow2.f32 %v1136_v63 }
 0x2ca   :  { %1283 = vrcp.f32 %v802_v1  ;;  %v815_v23 = vand.u32 2147483648, %v802_v1  ;;  %vm809_vm1 = vweird.f32 %v802_v1  ;;  %v813_v25 = vand.u32 2147483647, %v802_v1 }
 0x2cb   :  { %v776_v2 = vpop.f32.mrf.mxu3 }
 0x2cc   :  { %v1680_v4 = vadd.f32 %v1227_v51, %v776_v2  ;;  %v816_v31 = vor.u32 1.1754944e-38, %v815_v23  ;;  %vm814_vm4 = vcmp.eq.f32.partialorder %v813_v25, 8.507059e+37 }
 0x2ce   :  { %v1280_v5 = vpop.eup %1279  ;;  %v1138_v6 = vmul.f32 -1.442695, %v1680_v4 }
 0x2cf   :  { %v1282_v7 = vpop.eup %1281  ;;  %v842_v8 = vadd.f32 1.0, %v1280_v5 }
 0x2d0   :  { %v1284_v9 = vpop.eup %1283  ;;  %v803_v10 = vadd.f32 1.0, %v1282_v7  ;;  %1285 = vpow2.f32 %v1138_v6 }
 0x2d1   :  { %v805_v11 = vmul.f32 %v1284_v9, %v802_v1  ;;  %1287 = vrcp.f32 %v842_v8  ;;  %vm810_vm0 = vweird.f32 %v1284_v9  ;;  %v855_v38 = vand.u32 2147483648, %v842_v8 }
 0x2d2   :  { %1289 = vrcp.f32 %v803_v10  ;;  %v830_v26 = vand.u32 2147483648, %v803_v10  ;;  %vm811_vm2 = vmor %vm809_vm1, %vm810_vm0  ;;  %v828_v27 = vand.u32 2147483647, %v803_v10  ;;  %vm824_vm5 = vweird.f32 %v803_v10 }
 0x2d3   :  { %v806_v12 = vsub.f32 1.0, %v805_v11  ;;  %vm849_vm9 = vweird.f32 %v842_v8  ;;  %v853_v40 = vand.u32 2147483647, %v842_v8  ;;  %v856_v49 = vor.u32 1.1754944e-38, %v855_v38 }
 0x2d4   :  { %v831_v35 = vor.u32 1.1754944e-38, %v830_v26  ;;  %vm829_vm8 = vcmp.eq.f32.partialorder %v828_v27, 8.507059e+37 }
 0x2d5   :  { %v807_v13 = vmul.f32 %v1284_v9, %v806_v12  ;;  %vm854_vm12 = vcmp.eq.f32.partialorder %v853_v40, 8.507059e+37 }
 0x2d6   :  { %v1286_v14 = vpop.eup %1285 }
 0x2d7   :  { %v1288_v15 = vpop.eup %1287  ;;  %v843_v16 = vadd.f32 1.0, %v1286_v14  ;;  %v808_v21 = vadd.f32 %v1284_v9, %v807_v13 }
 0x2d8   :  { %v1290_v17 = vpop.eup %1289  ;;  %v845_v20 = vmul.f32 %v1288_v15, %v842_v8  ;;  %vm850_vm6 = vweird.f32 %v1288_v15 }
 0x2d9   :  { %v820_v22 = vmul.f32 %v1290_v17, %v803_v10  ;;  %1291 = vrcp.f32 %v843_v16  ;;  %v812_v29 = vsel %vm811_vm2, %v1284_v9, %v808_v21  ;;  %vm825_vm3 = vweird.f32 %v1290_v17  ;;  %vm851_vm10 = vmor %vm849_vm9, %vm850_vm6 }
 0x2da   :  { %v846_v24 = vsub.f32 1.0, %v845_v20  ;;  %v817_v36 = vsel %vm814_vm4, %v816_v31, %v812_v29  ;;  %vm826_vm7 = vmor %vm824_vm5, %vm825_vm3  ;;  %v870_v44 = vand.u32 2147483648, %v843_v16  ;;  %v868_v48 = vand.u32 2147483647, %v843_v16 }
 0x2db   :  { %v821_v18 = vsub.f32 1.0, %v820_v22  ;;  %v834_v43 = vmul.f32 %v817_v36, %v1671_v46  ;;  %vm864_vm13 = vweird.f32 %v843_v16 }
 0x2dc   :  { %v847_v28 = vmul.f32 %v1288_v15, %v846_v24  ;;  %v871_v53 = vor.u32 1.1754944e-38, %v870_v44  ;;  %vm869_vm15 = vcmp.eq.f32.partialorder %v868_v48, 8.507059e+37 }
 0x2dd   :  { %v822_v19 = vmul.f32 %v1290_v17, %v821_v18 }
 0x2de   :  { %v848_v37 = vadd.f32 %v1288_v15, %v847_v28 }
 0x2df   :  { %v1292_v32 = vpop.eup %1291  ;;  %v823_v34 = vadd.f32 %v1290_v17, %v822_v19 }
 0x2e0   :  { %v860_v30 = vmul.f32 %v1292_v32, %v843_v16  ;;  %v852_v45 = vsel %vm851_vm10, %v1288_v15, %v848_v37  ;;  %vm865_vm11 = vweird.f32 %v1292_v32 }
 0x2e1   :  { %v827_v39 = vsel %vm826_vm7, %v1290_v17, %v823_v34  ;;  %v857_v52 = vsel %vm854_vm12, %v856_v49, %v852_v45  ;;  %vm866_vm14 = vmor %vm864_vm13, %vm865_vm11 }
 0x2e2   :  { %v832_v41 = vsel %vm829_vm8, %v831_v35, %v827_v39  ;;  %v861_v42 = vsub.f32 1.0, %v860_v30  ;;  %v874_v55 = vmul.f32 %v857_v52, %v1674_v58 }
 0x2e3   :  { %v835_v33 = vmul.f32 %v832_v41, %v1676_v60 }
 0x2e4   :  { %v862_v47 = vmul.f32 %v1292_v32, %v861_v42 }
 0x2e5   :  { %v876_v50 = vpack.c.bf16 %v835_v33, %v834_v43 }
 0x2e6   :  { %v863_v51 = vadd.f32 %v1292_v32, %v862_v47 }
 0x2e7   :  { %936 = vmatmul.bf16.vlgmr.msra.gmra.mxu0 %v876_v50 }
 0x2e8   :  { %v867_v54 = vsel %vm866_vm14, %v1292_v32, %v863_v51 }
 0x2e9   :  { %v872_v46 = vsel %vm869_vm15, %v871_v53, %v867_v54 }
 0x2ea   :  { %v875_v56 = vmul.f32 %v872_v46, %v1680_v4 }
 0x2ec   :  { %v942_v57 = vpack.c.bf16 %v875_v56, %v874_v55 }
 0x2ee   :  { %951 = vmatmul.bf16.vlgmr.msra.gmra.mxu1 %v942_v57 }
 0x364   :  { %v937_v60 = vpop.f32.mrf.mxu0 }
 0x365   :  { %v938_v61 = vadd.f32 %v1228_v59, %v937_v60 }
 0x367   :  { %1293 = vtanh.f32 %v938_v61 }
 0x36b   :  { %v952_v62 = vpop.f32.mrf.mxu1 }
 0x36c   :  { %v953_v63 = vadd.f32 %v1228_v59, %v952_v62  ;;  %v939_v0 = vpop.f32.mrf.mxu0 }
 0x36d   :  { %v1294_v1 = vpop.eup %1293  ;;  %v940_v2 = vadd.f32 %v1228_v59, %v939_v0 }
 0x36e   :  { %959 = vst [vmem:[#allocation13] sm:$0xff] %v1294_v1  ;;  %1295 = vtanh.f32 %v953_v63 }
 0x36f   :  { %1297 = vtanh.f32 %v940_v2 }
 0x373   :  { %v954_v58 = vpop.f32.mrf.mxu1 }
 0x374   :  { %v1296_v3 = vpop.eup %1295  ;;  %v955_v4 = vadd.f32 %v1228_v59, %v954_v58 }
 0x375   :  { %v1298_v5 = vpop.eup %1297  ;;  %963 = vst [vmem:[#allocation13 + $0x10] sm:$0xff] %v1296_v3 }
 0x376   :  { %960 = vst [vmem:[#allocation13 + $0x8] sm:$0xff] %v1298_v5  ;;  %1299 = vtanh.f32 %v955_v4 }
 0x37c   :  { %v1300_v6 = vpop.eup %1299 }
 0x37d   :  { %964 = vst [vmem:[#allocation13 + $0x18] sm:$0xff] %v1300_v6 }
 0x37e   :  { %977 = dma.vmem_to_hbm [thread:$0]  %s970_s10, 512, %s972_s12, [#allocation4], %s1488_s13, %s1488_s13, %s1489_s14  }
 0x37f   :  { %1477 = dma.done.wait [#allocation4], 512  }
 0x380   :  { %1478 = vsyncadd [#allocation4], 4294966784 }
 0x381   :  { %982 = vsyncpa [#allocation3], 1 }
 0x382   :  { %983 = vsyncpa [#allocation6], 1 }
 0x383   :  { %984 = vsyncpa [#allocation9], 1 }
 0x384   :  { %985 = vsyncpa [#allocation12], 1 }
 0x385   :  { %986 = vsyncpa [#allocation4], 1 }

</bundles_post_ra>
